<compile_context>
chip_gen: v5e
topology: v5e:2x2
jax: 0.10.0
libtpu: 0.0.40
codegen_flags: <defaults>
</compile_context>

<pallas_src>
import functools

import jax
import jax.numpy as jnp
from jax.experimental import pallas as pl
from jax.experimental.pallas import tpu as pltpu


# ----------------------------- Pallas kernel ------------------------------ #
def _root_mlp_kernel(row_ref, w_ref, out_ref, *, NT, P):
    """row_ref: (1, 7*P)  = [emb | b0 | b1a | b1b | b2a | b2b | b3], each chunk 128-aligned.
    w_ref:   (P, 6*P)   = [w0 | w1a | w1b | w2a | w2b | w3], zero-padded to (P, P) blocks.
    out_ref: (1, P) log-probs in lanes [0, NT); padded lanes written as 0."""
    # Static, 128-aligned lane slices of the packed row (emb + biases).
    x   = row_ref[:, 0 * P:1 * P]
    b0  = row_ref[:, 1 * P:2 * P]
    b1a = row_ref[:, 2 * P:3 * P]
    b1b = row_ref[:, 3 * P:4 * P]
    b2a = row_ref[:, 4 * P:5 * P]
    b2b = row_ref[:, 5 * P:6 * P]
    b3  = row_ref[:, 6 * P:7 * P]

    # Static, 128-aligned lane slices of the packed weight slab.
    w0  = w_ref[:, 0 * P:1 * P]
    w1a = w_ref[:, 1 * P:2 * P]
    w1b = w_ref[:, 2 * P:3 * P]
    w2a = w_ref[:, 3 * P:4 * P]
    w2b = w_ref[:, 4 * P:5 * P]
    w3  = w_ref[:, 5 * P:6 * P]

    # Linear(dim, dim). Padded lanes of x are 0 and padded rows of w* are 0,
    # so padded output lanes stay exactly 0 throughout the chain.
    h = jnp.dot(x, w0, preferred_element_type=jnp.float32) + b0

    # ResLayer 1: relu(Linear(relu(Linear(h)))) + h
    t = jnp.maximum(jnp.dot(h, w1a, preferred_element_type=jnp.float32) + b1a, 0.0)
    t = jnp.maximum(jnp.dot(t, w1b, preferred_element_type=jnp.float32) + b1b, 0.0)
    h = t + h

    # ResLayer 2
    t = jnp.maximum(jnp.dot(h, w2a, preferred_element_type=jnp.float32) + b2a, 0.0)
    t = jnp.maximum(jnp.dot(t, w2b, preferred_element_type=jnp.float32) + b2b, 0.0)
    h = t + h

    # Final Linear(dim, NT): lanes >= NT are exactly 0 (zero weight cols, zero bias).
    logits = jnp.dot(h, w3, preferred_element_type=jnp.float32) + b3

    # Numerically stable log_softmax over the first NT lanes only.
    lane = jax.lax.broadcasted_iota(jnp.int32, (1, P), 1)
    valid = lane < NT
    masked = jnp.where(valid, logits, -jnp.inf)
    m = jnp.max(masked, axis=-1, keepdims=True)
    z = masked - m
    e = jnp.where(valid, jnp.exp(z), 0.0)
    lse = jnp.log(jnp.sum(e, axis=-1, keepdims=True))
    out_ref[...] = jnp.where(valid, z - lse, 0.0)


# ------------------------------- Packing ----------------------------------- #
def pack_params(params):
    """One-time packing of the 13 small tensors into 2 lane-dense, 128-aligned slabs.

    Returns:
      row: (1, 7*P) [emb|b0|b1a|b1b|b2a|b2b|b3], each chunk zero-padded to P lanes.
      w:   (P, 6*P) [w0|w1a|w1b|w2a|w2b|w3], each block zero-padded to (P, P).
      NT:  number of nonterminals (width of the valid output).
    """
    dim = params["w0"].shape[0]
    NT = params["w3"].shape[1]
    P = pl.cdiv(max(dim, NT), 128) * 128

    def pad_cols(a):                      # (1, c) -> (1, P)
        return jnp.pad(a, ((0, 0), (0, P - a.shape[1])))

    def pad_block(a):                     # (dim, c) -> (P, P)
        return jnp.pad(a, ((0, P - a.shape[0]), (0, P - a.shape[1])))

    row = jnp.concatenate(
        [pad_cols(params[k]) for k in
         ("root_emb", "b0", "b1a", "b1b", "b2a", "b2b", "b3")], axis=1)
    w = jnp.concatenate(
        [pad_block(params[k]) for k in
         ("w0", "w1a", "w1b", "w2a", "w2b", "w3")], axis=1)
    return row.astype(jnp.float32), w.astype(jnp.float32), NT


# ------------------------------- Wrapper ----------------------------------- #
def root_parameterizer_forward(row, w, NT):
    """row: (1, 7*P) packed emb+biases; w: (P, 6*P) packed weights.
    Returns (1, NT) log-probs."""
    P = w.shape[0]
    assert w.shape == (P, 6 * P) and row.shape == (1, 7 * P)
    vmem = pl.BlockSpec(memory_space=pltpu.MemorySpace.VMEM)
    kernel = functools.partial(_root_mlp_kernel, NT=NT, P=P)
    out_padded = pl.pallas_call(
        kernel,
        out_shape=jax.ShapeDtypeStruct((1, P), jnp.float32),
        in_specs=[vmem, vmem],
        out_specs=vmem,
    )(row, w)
    # In a fused consumer this slice is unnecessary (read lanes [0, NT) directly).
    return out_padded[:, :NT]


# ------------------------- Deterministic param init ------------------------ #
def init_params(key, dim, NT):
    """Mimics torch defaults: root_emb ~ N(0,1); Linear weights/biases uniform
    in [-1/sqrt(fan_in), 1/sqrt(fan_in)]. Weights stored transposed (in, out)."""
    ks = jax.random.split(key, 16)

    def linear(kw, kb, fan_in, fan_out):
        bound = 1.0 / (fan_in ** 0.5)
        wt = jax.random.uniform(kw, (fan_in, fan_out), jnp.float32, -bound, bound)
        b = jax.random.uniform(kb, (1, fan_out), jnp.float32, -bound, bound)
        return wt, b

    params = {}
    params["root_emb"] = jax.random.normal(ks[0], (1, dim), jnp.float32)
    params["w0"],  params["b0"]  = linear(ks[1],  ks[2],  dim, dim)
    params["w1a"], params["b1a"] = linear(ks[3],  ks[4],  dim, dim)
    params["w1b"], params["b1b"] = linear(ks[5],  ks[6],  dim, dim)
    params["w2a"], params["b2a"] = linear(ks[7],  ks[8],  dim, dim)
    params["w2b"], params["b2b"] = linear(ks[9],  ks[10], dim, dim)
    params["w3"],  params["b3"]  = linear(ks[11], ks[12], dim, NT)
    return params


# --------------------------- Pure-JAX reference ----------------------------- #
def _reference(p):
    x = p["root_emb"]
    h = x @ p["w0"] + p["b0"]
    t = jnp.maximum(h @ p["w1a"] + p["b1a"], 0.0)
    t = jnp.maximum(t @ p["w1b"] + p["b1b"], 0.0)
    h = t + h
    t = jnp.maximum(h @ p["w2a"] + p["b2a"], 0.0)
    t = jnp.maximum(t @ p["w2b"] + p["b2b"], 0.0)
    h = t + h
    logits = h @ p["w3"] + p["b3"]
    return jax.nn.log_softmax(logits, axis=-1)


if __name__ == "__main__":
    dim, NT = 32, 16                      # small shapes consistent with the module
    params = init_params(jax.random.PRNGKey(0), dim, NT)

    # Pack once (outside the per-call path); a call then costs only 2 DMAs.
    row, w, nt = pack_params(params)
    row = jax.block_until_ready(row)
    w = jax.block_until_ready(w)

    out = root_parameterizer_forward(row, w, nt)
    out = jax.block_until_ready(out)

    ref = _reference(params)
    assert out.shape == (1, NT)
    assert jnp.allclose(out, ref, atol=1e-5, rtol=1e-5), "mismatch vs reference"
    # log_softmax sanity: row sums to 1 in prob space.
    assert jnp.allclose(jnp.sum(jnp.exp(out), axis=-1), 1.0, atol=1e-5)

    print("KERNEL_OK")
</pallas_src>

<mosaic_0001>
module attributes {stable_mosaic.version = 11 : i64} {
  func.func @_root_mlp_kernel(%arg0: memref<1x896xf32, #tpu.memory_space<vmem>>, %arg1: memref<128x768xf32, #tpu.memory_space<vmem>>, %arg2: memref<1x128xf32, #tpu.memory_space<vmem>>) attributes {dimension_semantics = [], scalar_prefetch = 0 : i64, scratch_operands = 0 : i64, tpu.core_type = #tpu.core_type<tc>} {
    %c0 = arith.constant 0 : index
    %c0_0 = arith.constant 0 : index
    %0 = vector.load %arg0[%c0, %c0_0] : memref<1x896xf32, #tpu.memory_space<vmem>>, vector<1x128xf32>
    %c0_1 = arith.constant 0 : index
    %c128 = arith.constant 128 : index
    %1 = vector.load %arg0[%c0_1, %c128] : memref<1x896xf32, #tpu.memory_space<vmem>>, vector<1x128xf32>
    %c0_2 = arith.constant 0 : index
    %c256 = arith.constant 256 : index
    %2 = vector.load %arg0[%c0_2, %c256] : memref<1x896xf32, #tpu.memory_space<vmem>>, vector<1x128xf32>
    %c0_3 = arith.constant 0 : index
    %c384 = arith.constant 384 : index
    %3 = vector.load %arg0[%c0_3, %c384] : memref<1x896xf32, #tpu.memory_space<vmem>>, vector<1x128xf32>
    %c0_4 = arith.constant 0 : index
    %c512 = arith.constant 512 : index
    %4 = vector.load %arg0[%c0_4, %c512] : memref<1x896xf32, #tpu.memory_space<vmem>>, vector<1x128xf32>
    %c0_5 = arith.constant 0 : index
    %c640 = arith.constant 640 : index
    %5 = vector.load %arg0[%c0_5, %c640] : memref<1x896xf32, #tpu.memory_space<vmem>>, vector<1x128xf32>
    %c0_6 = arith.constant 0 : index
    %c768 = arith.constant 768 : index
    %6 = vector.load %arg0[%c0_6, %c768] : memref<1x896xf32, #tpu.memory_space<vmem>>, vector<1x128xf32>
    %c0_7 = arith.constant 0 : index
    %c0_8 = arith.constant 0 : index
    %7 = vector.load %arg1[%c0_7, %c0_8] : memref<128x768xf32, #tpu.memory_space<vmem>>, vector<128x128xf32>
    %c0_9 = arith.constant 0 : index
    %c128_10 = arith.constant 128 : index
    %8 = vector.load %arg1[%c0_9, %c128_10] : memref<128x768xf32, #tpu.memory_space<vmem>>, vector<128x128xf32>
    %c0_11 = arith.constant 0 : index
    %c256_12 = arith.constant 256 : index
    %9 = vector.load %arg1[%c0_11, %c256_12] : memref<128x768xf32, #tpu.memory_space<vmem>>, vector<128x128xf32>
    %c0_13 = arith.constant 0 : index
    %c384_14 = arith.constant 384 : index
    %10 = vector.load %arg1[%c0_13, %c384_14] : memref<128x768xf32, #tpu.memory_space<vmem>>, vector<128x128xf32>
    %c0_15 = arith.constant 0 : index
    %c512_16 = arith.constant 512 : index
    %11 = vector.load %arg1[%c0_15, %c512_16] : memref<128x768xf32, #tpu.memory_space<vmem>>, vector<128x128xf32>
    %c0_17 = arith.constant 0 : index
    %c640_18 = arith.constant 640 : index
    %12 = vector.load %arg1[%c0_17, %c640_18] : memref<128x768xf32, #tpu.memory_space<vmem>>, vector<128x128xf32>
    %cst = arith.constant dense<0.000000e+00> : vector<1x128xf32>
    %13 = tpu.matmul %0, %7, %cst {dimension_numbers = #tpu.dot_dimension_numbers<[1], [0], [0], [1], [0, 0, 1, 1], [], []>} : vector<1x128xf32>, vector<128x128xf32>, vector<1x128xf32> -> vector<1x128xf32>
    %14 = arith.addf %13, %1 : vector<1x128xf32>
    %cst_19 = arith.constant dense<0.000000e+00> : vector<1x128xf32>
    %15 = tpu.matmul %14, %8, %cst_19 {dimension_numbers = #tpu.dot_dimension_numbers<[1], [0], [0], [1], [0, 0, 1, 1], [], []>} : vector<1x128xf32>, vector<128x128xf32>, vector<1x128xf32> -> vector<1x128xf32>
    %16 = arith.addf %15, %2 : vector<1x128xf32>
    %cst_20 = arith.constant 0.000000e+00 : f32
    %17 = vector.broadcast %cst_20 : f32 to vector<1x128xf32>
    %18 = arith.maximumf %16, %17 : vector<1x128xf32>
    %cst_21 = arith.constant dense<0.000000e+00> : vector<1x128xf32>
    %19 = tpu.matmul %18, %9, %cst_21 {dimension_numbers = #tpu.dot_dimension_numbers<[1], [0], [0], [1], [0, 0, 1, 1], [], []>} : vector<1x128xf32>, vector<128x128xf32>, vector<1x128xf32> -> vector<1x128xf32>
    %20 = arith.addf %19, %3 : vector<1x128xf32>
    %cst_22 = arith.constant 0.000000e+00 : f32
    %21 = vector.broadcast %cst_22 : f32 to vector<1x128xf32>
    %22 = arith.maximumf %20, %21 : vector<1x128xf32>
    %23 = arith.addf %22, %14 : vector<1x128xf32>
    %cst_23 = arith.constant dense<0.000000e+00> : vector<1x128xf32>
    %24 = tpu.matmul %23, %10, %cst_23 {dimension_numbers = #tpu.dot_dimension_numbers<[1], [0], [0], [1], [0, 0, 1, 1], [], []>} : vector<1x128xf32>, vector<128x128xf32>, vector<1x128xf32> -> vector<1x128xf32>
    %25 = arith.addf %24, %4 : vector<1x128xf32>
    %cst_24 = arith.constant 0.000000e+00 : f32
    %26 = vector.broadcast %cst_24 : f32 to vector<1x128xf32>
    %27 = arith.maximumf %25, %26 : vector<1x128xf32>
    %cst_25 = arith.constant dense<0.000000e+00> : vector<1x128xf32>
    %28 = tpu.matmul %27, %11, %cst_25 {dimension_numbers = #tpu.dot_dimension_numbers<[1], [0], [0], [1], [0, 0, 1, 1], [], []>} : vector<1x128xf32>, vector<128x128xf32>, vector<1x128xf32> -> vector<1x128xf32>
    %29 = arith.addf %28, %5 : vector<1x128xf32>
    %cst_26 = arith.constant 0.000000e+00 : f32
    %30 = vector.broadcast %cst_26 : f32 to vector<1x128xf32>
    %31 = arith.maximumf %29, %30 : vector<1x128xf32>
    %32 = arith.addf %31, %23 : vector<1x128xf32>
    %cst_27 = arith.constant dense<0.000000e+00> : vector<1x128xf32>
    %33 = tpu.matmul %32, %12, %cst_27 {dimension_numbers = #tpu.dot_dimension_numbers<[1], [0], [0], [1], [0, 0, 1, 1], [], []>} : vector<1x128xf32>, vector<128x128xf32>, vector<1x128xf32> -> vector<1x128xf32>
    %34 = arith.addf %33, %6 : vector<1x128xf32>
    %35 = tpu.iota {dimensions = array<i32: 1>} : vector<1x128xi32>
    %c16_i32 = arith.constant 16 : i32
    %36 = vector.broadcast %c16_i32 : i32 to vector<1x128xi32>
    %37 = arith.cmpi slt, %35, %36 : vector<1x128xi32>
    %cst_28 = arith.constant 0xFF800000 : f32
    %38 = vector.broadcast %cst_28 : f32 to vector<1x128xf32>
    %39 = arith.select %37, %34, %38 : vector<1x128xi1>, vector<1x128xf32>
    %cst_29 = arith.constant dense<0xFF800000> : vector<1xf32>
    %40 = vector.multi_reduction <maximumf>, %39, %cst_29 [1] : vector<1x128xf32> to vector<1xf32>
    %41 = vector.shape_cast %40 : vector<1xf32> to vector<1x1xf32>
    %42 = vector.broadcast %41 : vector<1x1xf32> to vector<1x128xf32>
    %43 = arith.subf %39, %42 : vector<1x128xf32>
    %44 = math.exp %43 : vector<1x128xf32>
    %cst_30 = arith.constant 0.000000e+00 : f32
    %45 = vector.broadcast %cst_30 : f32 to vector<1x128xf32>
    %46 = arith.select %37, %44, %45 : vector<1x128xi1>, vector<1x128xf32>
    %cst_31 = arith.constant dense<0.000000e+00> : vector<1xf32>
    %47 = vector.multi_reduction <add>, %46, %cst_31 [1] : vector<1x128xf32> to vector<1xf32>
    %48 = vector.shape_cast %47 : vector<1xf32> to vector<1x1xf32>
    %49 = math.log %48 : vector<1x1xf32>
    %50 = vector.broadcast %49 : vector<1x1xf32> to vector<1x128xf32>
    %51 = arith.subf %43, %50 : vector<1x128xf32>
    %cst_32 = arith.constant 0.000000e+00 : f32
    %52 = vector.broadcast %cst_32 : f32 to vector<1x128xf32>
    %53 = arith.select %37, %51, %52 : vector<1x128xi1>, vector<1x128xf32>
    %c0_33 = arith.constant 0 : index
    %c0_34 = arith.constant 0 : index
    %54 = vector.load %arg2[%c0_33, %c0_34] : memref<1x128xf32, #tpu.memory_space<vmem>>, vector<1x128xf32>
    tpu.vector_store %arg2[%c0_33, %c0_34], %53 {strides = array<i32>} : memref<1x128xf32, #tpu.memory_space<vmem>>, vector<1x128xf32>,
    return
  }
}

</mosaic_0001>

<bundles_post_ra>
// kernel: tpu_custom_call.1
= control target key start
LH: loop header
LB: loop body
LE: loop exit
PB: predicated region body
PF: predicated region fallthrough
CT: control target
= control target key end

     0   :  { %7 = vsyncpa [#allocation3], 0  ;;  %s432_s0 = inlined_call_operand.hbm [shape: f32[1,896], index: 0, kind: input, shape index: {}]   ;;  %s433_s1 = inlined_call_operand.hbm [shape: f32[128,768], index: 1, kind: input, shape index: {}]   ;;  %s434_s2 = inlined_call_operand.hbm [shape: f32[1,128], index: 2, kind: output, shape index: {}]  }
   0x1   :  { %8 = vsyncpa [#allocation6], 0 }
   0x2   :  { %9 = vsyncpa [#allocation4], 0  ;;  %s15_s11 = sshll.u32 %s432_s0, 4  ;;  %s396_s12 = smov [#allocation2]   ;;  %s16_s11 = int_to_ptr.hbm [resolvable:$true] %s15_s11 }
   0x3   :  { %s17_s13 = sshll.u32 %s396_s12, 4  ;;  %s25_s16 = sshll.u32 %s433_s1, 4  ;;  %s18_s13 = int_to_ptr.vmem [resolvable:$true] %s17_s13  ;;  %s26_s16 = int_to_ptr.hbm [resolvable:$true] %s25_s16 }
   0x4   :  { %20 = dma.hbm_to_vmem [thread:$0]  %s16_s11, 112, %s18_s13, [#allocation3]  }
   0x5   :  { %s397_s17 = smov [#allocation5]   ;;  %s398_s19 = smov 768  }
   0x6   :  { %s27_s18 = sshll.u32 %s397_s17, 4  ;;  %s399_s20 = smov 48   ;;  %s28_s18 = int_to_ptr.vmem [resolvable:$true] %s27_s18 }
   0x7   :  { %33 = dma.hbm_to_vmem [thread:$0]  %s26_s16, 12288, %s28_s18, [#allocation6], %s398_s19, %s398_s19, %s399_s20  }
   0x8   :  { %390 = dma.done.wait [#allocation3], 112  }
   0x9   :  { %391 = vsyncadd [#allocation3], 4294967184 }
   0xa   :  { %392 = dma.done.wait [#allocation6], 12288  }
   0xb   :  { %393 = vsyncadd [#allocation6], 4294955008  ;;  %v64_v0 = vld [vmem:[#allocation5 + $0x2d0] sm:$0xff]  ;;  %v63_v1 = vld [vmem:[#allocation5 + $0x2a0] sm:$0xff]  ;;  %vm275_vm1 = vcmask 1040384   ;;  %s400_s0 = smov [#allocation7]  }
   0xc   :  { %145 = vmatpush.msra.mxu0 %v64_v0  ;;  %v62_v2 = vld [vmem:[#allocation5 + $0x270] sm:$0xff]  ;;  %v61_v3 = vld [vmem:[#allocation5 + $0x240] sm:$0xff]  ;;  %v80_v4 = vld [vmem:[#allocation5 + $0x2d8] sm:$0xff]  ;;  %s296_s1 = sshll.u32 %s400_s0, 4  ;;  %s298_s23 = sshll.u32 %s434_s2, 4  ;;  %s297_s1 = int_to_ptr.vmem [resolvable:$true] %s296_s1  ;;  %s299_s23 = int_to_ptr.hbm [resolvable:$true] %s298_s23 }
   0xd   :  { %v60_v5 = vld [vmem:[#allocation5 + $0x210] sm:$0xff]  ;;  %165 = vmatpush.msra.mxu1 %v80_v4  ;;  %v79_v6 = vld [vmem:[#allocation5 + $0x2a8] sm:$0xff]  ;;  %v78_v7 = vld [vmem:[#allocation5 + $0x278] sm:$0xff] }
   0xe   :  { %146 = vmatpush.msra.mxu0 %v63_v1  ;;  %v59_v8 = vld [vmem:[#allocation5 + $0x1e0] sm:$0xff]  ;;  %v77_v9 = vld [vmem:[#allocation5 + $0x248] sm:$0xff]  ;;  %v58_v10 = vld [vmem:[#allocation5 + $0x1b0] sm:$0xff] }
   0xf   :  { %166 = vmatpush.msra.mxu1 %v79_v6  ;;  %v76_v11 = vld [vmem:[#allocation5 + $0x218] sm:$0xff]  ;;  %v57_v12 = vld [vmem:[#allocation5 + $0x180] sm:$0xff]  ;;  %v75_v13 = vld [vmem:[#allocation5 + $0x1e8] sm:$0xff] }
  0x10   :  { %147 = vmatpush.msra.mxu0 %v62_v2  ;;  %v56_v14 = vld [vmem:[#allocation5 + $0x150] sm:$0xff]  ;;  %v74_v15 = vld [vmem:[#allocation5 + $0x1b8] sm:$0xff]  ;;  %v55_v16 = vld [vmem:[#allocation5 + $0x120] sm:$0xff] }
  0x11   :  { %167 = vmatpush.msra.mxu1 %v78_v7  ;;  %v73_v17 = vld [vmem:[#allocation5 + $0x188] sm:$0xff]  ;;  %v54_v18 = vld [vmem:[#allocation5 + $0xf0] sm:$0xff]  ;;  %v72_v19 = vld [vmem:[#allocation5 + $0x158] sm:$0xff] }
  0x12   :  { %148 = vmatpush.msra.mxu0 %v61_v3  ;;  %v53_v20 = vld [vmem:[#allocation5 + $0xc0] sm:$0xff]  ;;  %v71_v21 = vld [vmem:[#allocation5 + $0x128] sm:$0xff]  ;;  %v52_v22 = vld [vmem:[#allocation5 + $0x90] sm:$0xff] }
  0x13   :  { %168 = vmatpush.msra.mxu1 %v77_v9  ;;  %v70_v23 = vld [vmem:[#allocation5 + $0xf8] sm:$0xff]  ;;  %v51_v24 = vld [vmem:[#allocation5 + $0x60] sm:$0xff]  ;;  %v69_v25 = vld [vmem:[#allocation5 + $0xc8] sm:$0xff] }
  0x14   :  { %149 = vmatpush.msra.mxu0 %v60_v5  ;;  %v50_v26 = vld [vmem:[#allocation5 + $0x30] sm:$0xff]  ;;  %v68_v27 = vld [vmem:[#allocation5 + $0x98] sm:$0xff]  ;;  %v49_v28 = vld [vmem:[#allocation5] sm:$0xff] }
  0x15   :  { %169 = vmatpush.msra.mxu1 %v76_v11  ;;  %v42_v29 = vld [vmem:[#allocation2] sm:$0x1]  ;;  %v67_v30 = vld [vmem:[#allocation5 + $0x68] sm:$0xff]  ;;  %v96_v33 = vld [vmem:[#allocation5 + $0x2e0] sm:$0xff] }
  0x16   :  { %150 = vmatpush.msra.mxu0 %v59_v8  ;;  %v66_v31 = vld [vmem:[#allocation5 + $0x38] sm:$0xff]  ;;  %v65_v32 = vld [vmem:[#allocation5 + $0x8] sm:$0xff]  ;;  %v95_v34 = vld [vmem:[#allocation5 + $0x2b0] sm:$0xff]  ;;  %186 = vmatpush.msra.mxu2 %v96_v33 }
  0x17   :  { %170 = vmatpush.msra.mxu1 %v75_v13  ;;  %v94_v35 = vld [vmem:[#allocation5 + $0x280] sm:$0xff]  ;;  %v93_v36 = vld [vmem:[#allocation5 + $0x250] sm:$0xff]  ;;  %v43_v46 = vld [vmem:[#allocation2 + $0x1] sm:$0x1] }
  0x18   :  { %151 = vmatpush.msra.mxu0 %v58_v10  ;;  %187 = vmatpush.msra.mxu2 %v95_v34  ;;  %v92_v37 = vld [vmem:[#allocation5 + $0x220] sm:$0xff]  ;;  %v91_v38 = vld [vmem:[#allocation5 + $0x1f0] sm:$0xff]  ;;  %v112_v52 = vld [vmem:[#allocation5 + $0x2e8] sm:$0xff] }
  0x19   :  { %171 = vmatpush.msra.mxu1 %v74_v15  ;;  %v90_v39 = vld [vmem:[#allocation5 + $0x1c0] sm:$0xff]  ;;  %v89_v40 = vld [vmem:[#allocation5 + $0x190] sm:$0xff]  ;;  %v111_v53 = vld [vmem:[#allocation5 + $0x2b8] sm:$0xff]  ;;  %208 = vmatpush.msra.mxu3 %v112_v52 }
  0x1a   :  { %152 = vmatpush.msra.mxu0 %v57_v12  ;;  %188 = vmatpush.msra.mxu2 %v94_v35  ;;  %v88_v41 = vld [vmem:[#allocation5 + $0x160] sm:$0xff]  ;;  %v87_v42 = vld [vmem:[#allocation5 + $0x130] sm:$0xff]  ;;  %v110_v54 = vld [vmem:[#allocation5 + $0x288] sm:$0xff] }
  0x1b   :  { %172 = vmatpush.msra.mxu1 %v73_v17  ;;  %v86_v43 = vld [vmem:[#allocation5 + $0x100] sm:$0xff]  ;;  %v85_v44 = vld [vmem:[#allocation5 + $0xd0] sm:$0xff]  ;;  %209 = vmatpush.msra.mxu3 %v111_v53  ;;  %v109_v55 = vld [vmem:[#allocation5 + $0x258] sm:$0xff] }
  0x1c   :  { %153 = vmatpush.msra.mxu0 %v56_v14  ;;  %189 = vmatpush.msra.mxu2 %v93_v36  ;;  %v84_v45 = vld [vmem:[#allocation5 + $0xa0] sm:$0xff]  ;;  %v83_v49 = vld [vmem:[#allocation5 + $0x70] sm:$0xff]  ;;  %v108_v56 = vld [vmem:[#allocation5 + $0x228] sm:$0xff] }
  0x1d   :  { %173 = vmatpush.msra.mxu1 %v72_v19  ;;  %v82_v50 = vld [vmem:[#allocation5 + $0x40] sm:$0xff]  ;;  %v81_v51 = vld [vmem:[#allocation5 + $0x10] sm:$0xff]  ;;  %210 = vmatpush.msra.mxu3 %v110_v54  ;;  %v107_v57 = vld [vmem:[#allocation5 + $0x1f8] sm:$0xff]  ;;  %v271_v54 = vlaneseq }
  0x1e   :  { %154 = vmatpush.msra.mxu0 %v55_v16  ;;  %190 = vmatpush.msra.mxu2 %v92_v37  ;;  %v106_v58 = vld [vmem:[#allocation5 + $0x1c8] sm:$0xff]  ;;  %v105_v59 = vld [vmem:[#allocation5 + $0x198] sm:$0xff]  ;;  %v128_v8 = vld [vmem:[#allocation5 + $0x2f0] sm:$0xff] }
  0x1f   :  { %174 = vmatpush.msra.mxu1 %v71_v21  ;;  %211 = vmatpush.msra.mxu3 %v109_v55  ;;  %v104_v60 = vld [vmem:[#allocation5 + $0x168] sm:$0xff]  ;;  %v103_v61 = vld [vmem:[#allocation5 + $0x138] sm:$0xff]  ;;  %v127_v9 = vld [vmem:[#allocation5 + $0x2c0] sm:$0xff]  ;;  %v272_v55 = vand.u32 127, %v271_v54 }
  0x20   :  { %155 = vmatpush.msra.mxu0 %v54_v18  ;;  %191 = vmatpush.msra.mxu2 %v91_v38  ;;  %v102_v62 = vld [vmem:[#allocation5 + $0x108] sm:$0xff]  ;;  %v101_v63 = vld [vmem:[#allocation5 + $0xd8] sm:$0xff]  ;;  %v126_v10 = vld [vmem:[#allocation5 + $0x290] sm:$0xff] }
  0x21   :  { %175 = vmatpush.msra.mxu1 %v70_v23  ;;  %212 = vmatpush.msra.mxu3 %v108_v56  ;;  %v44_v0 = vld [vmem:[#allocation2 + $0x2] sm:$0x1]  ;;  %v100_v4 = vld [vmem:[#allocation5 + $0xa8] sm:$0xff]  ;;  %v125_v11 = vld [vmem:[#allocation5 + $0x260] sm:$0xff]  ;;  %vm273_vm0 = vcmp.lt.s32.totalorder %v272_v55, 16 }
  0x22   :  { %156 = vmatpush.msra.mxu0 %v53_v20  ;;  %192 = vmatpush.msra.mxu2 %v90_v39  ;;  %v99_v5 = vld [vmem:[#allocation5 + $0x78] sm:$0xff]  ;;  %v98_v6 = vld [vmem:[#allocation5 + $0x48] sm:$0xff]  ;;  %v124_v12 = vld [vmem:[#allocation5 + $0x230] sm:$0xff] }
  0x23   :  { %176 = vmatpush.msra.mxu1 %v69_v25  ;;  %213 = vmatpush.msra.mxu3 %v107_v57  ;;  %v97_v7 = vld [vmem:[#allocation5 + $0x18] sm:$0xff]  ;;  %v123_v13 = vld [vmem:[#allocation5 + $0x200] sm:$0xff]  ;;  %v122_v14 = vld [vmem:[#allocation5 + $0x1d0] sm:$0xff] }
  0x24   :  { %157 = vmatpush.msra.mxu0 %v52_v22  ;;  %193 = vmatpush.msra.mxu2 %v89_v40  ;;  %v121_v15 = vld [vmem:[#allocation5 + $0x1a0] sm:$0xff]  ;;  %v120_v16 = vld [vmem:[#allocation5 + $0x170] sm:$0xff]  ;;  %v45_v21 = vld [vmem:[#allocation2 + $0x3] sm:$0x1] }
  0x25   :  { %177 = vmatpush.msra.mxu1 %v68_v27  ;;  %214 = vmatpush.msra.mxu3 %v106_v58  ;;  %v119_v17 = vld [vmem:[#allocation5 + $0x140] sm:$0xff]  ;;  %v118_v18 = vld [vmem:[#allocation5 + $0x110] sm:$0xff]  ;;  %v140_v33 = vld [vmem:[#allocation5 + $0x238] sm:$0xff] }
  0x26   :  { %158 = vmatpush.msra.mxu0 %v51_v24  ;;  %194 = vmatpush.msra.mxu2 %v88_v41  ;;  %v117_v19 = vld [vmem:[#allocation5 + $0xe0] sm:$0xff]  ;;  %v116_v20 = vld [vmem:[#allocation5 + $0xb0] sm:$0xff]  ;;  %v139_v34 = vld [vmem:[#allocation5 + $0x208] sm:$0xff] }
  0x27   :  { %178 = vmatpush.msra.mxu1 %v67_v30  ;;  %215 = vmatpush.msra.mxu3 %v105_v59  ;;  %v114_v27 = vld [vmem:[#allocation5 + $0x50] sm:$0xff]  ;;  %v143_v30 = vld [vmem:[#allocation5 + $0x2c8] sm:$0xff]  ;;  %v138_v35 = vld [vmem:[#allocation5 + $0x1d8] sm:$0xff] }
  0x28   :  { %159 = vmatpush.msra.mxu0 %v50_v26  ;;  %195 = vmatpush.msra.mxu2 %v87_v42  ;;  %v115_v26 = vld [vmem:[#allocation5 + $0x80] sm:$0xff]  ;;  %v137_v36 = vld [vmem:[#allocation5 + $0x1a8] sm:$0xff]  ;;  %v136_v37 = vld [vmem:[#allocation5 + $0x178] sm:$0xff] }
  0x29   :  { %179 = vmatpush.msra.mxu1 %v66_v31  ;;  %216 = vmatpush.msra.mxu3 %v104_v60  ;;  %v142_v31 = vld [vmem:[#allocation5 + $0x298] sm:$0xff]  ;;  %v135_v38 = vld [vmem:[#allocation5 + $0x148] sm:$0xff] }
  0x2a   :  { %160 = vmatpush.msra.mxu0 %v49_v28  ;;  %196 = vmatpush.msra.mxu2 %v86_v43  ;;  %v113_v28 = vld [vmem:[#allocation5 + $0x20] sm:$0xff]  ;;  %v134_v39 = vld [vmem:[#allocation5 + $0x118] sm:$0xff]  ;;  %v133_v40 = vld [vmem:[#allocation5 + $0xe8] sm:$0xff] }
  0x2b   :  { %161 = vmatmul.f32.vlgmr.msra.gmra.mxu0 %v42_v29  ;;  %180 = vmatpush.msra.mxu1 %v65_v32  ;;  %v144_v29 = vld [vmem:[#allocation5 + $0x2f8] sm:$0xff]  ;;  %v141_v32 = vld [vmem:[#allocation5 + $0x268] sm:$0xff] }
  0x2c   :  { %197 = vmatpush.msra.mxu2 %v85_v44  ;;  %217 = vmatpush.msra.mxu3 %v103_v61  ;;  %v46_v41 = vld [vmem:[#allocation2 + $0x4] sm:$0x1]  ;;  %v48_v56 = vld [vmem:[#allocation2 + $0x6] sm:$0x1] }
  0x2d   :  { %229 = vmatpush.msrb.mxu0 %v128_v8  ;;  %251 = vmatpush.msrb.mxu1 %v144_v29 }
  0x2e   :  { %198 = vmatpush.msra.mxu2 %v84_v45  ;;  %218 = vmatpush.msra.mxu3 %v102_v62  ;;  %v132_v45 = vld [vmem:[#allocation5 + $0xb8] sm:$0xff] }
  0x2f   :  { %230 = vmatpush.msrb.mxu0 %v127_v9  ;;  %252 = vmatpush.msrb.mxu1 %v143_v30 }
  0x30   :  { %199 = vmatpush.msra.mxu2 %v83_v49  ;;  %219 = vmatpush.msra.mxu3 %v101_v63  ;;  %v47_v49 = vld [vmem:[#allocation2 + $0x5] sm:$0x1] }
  0x31   :  { %231 = vmatpush.msrb.mxu0 %v126_v10  ;;  %253 = vmatpush.msrb.mxu1 %v142_v31 }
  0x32   :  { %200 = vmatpush.msra.mxu2 %v82_v50  ;;  %220 = vmatpush.msra.mxu3 %v100_v4 }
  0x33   :  { %232 = vmatpush.msrb.mxu0 %v125_v11  ;;  %254 = vmatpush.msrb.mxu1 %v141_v32 }
  0x34   :  { %201 = vmatpush.msra.mxu2 %v81_v51  ;;  %221 = vmatpush.msra.mxu3 %v99_v5 }
  0x35   :  { %233 = vmatpush.msrb.mxu0 %v124_v12  ;;  %255 = vmatpush.msrb.mxu1 %v140_v33 }
  0x36   :  { %222 = vmatpush.msra.mxu3 %v98_v6 }
  0x37   :  { %234 = vmatpush.msrb.mxu0 %v123_v13  ;;  %256 = vmatpush.msrb.mxu1 %v139_v34 }
  0x38   :  { %223 = vmatpush.msra.mxu3 %v97_v7 }
  0x39   :  { %235 = vmatpush.msrb.mxu0 %v122_v14  ;;  %257 = vmatpush.msrb.mxu1 %v138_v35 }
  0x3b   :  { %236 = vmatpush.msrb.mxu0 %v121_v15  ;;  %258 = vmatpush.msrb.mxu1 %v137_v36 }
  0x3d   :  { %237 = vmatpush.msrb.mxu0 %v120_v16  ;;  %259 = vmatpush.msrb.mxu1 %v136_v37 }
  0x3f   :  { %238 = vmatpush.msrb.mxu0 %v119_v17  ;;  %260 = vmatpush.msrb.mxu1 %v135_v38 }
  0x41   :  { %239 = vmatpush.msrb.mxu0 %v118_v18  ;;  %261 = vmatpush.msrb.mxu1 %v134_v39 }
  0x43   :  { %240 = vmatpush.msrb.mxu0 %v117_v19  ;;  %262 = vmatpush.msrb.mxu1 %v133_v40 }
  0x45   :  { %241 = vmatpush.msrb.mxu0 %v116_v20  ;;  %263 = vmatpush.msrb.mxu1 %v132_v45 }
  0x47   :  { %242 = vmatpush.msrb.mxu0 %v115_v26 }
  0x49   :  { %243 = vmatpush.msrb.mxu0 %v114_v27 }
  0x4b   :  { %244 = vmatpush.msrb.mxu0 %v113_v28 }
  0xa8   :  { %v162_v47 = vpop.f32.mrf.mxu0 }
  0xa9   :  { %v422_v48 = vadd.f32 %v162_v47, %v43_v46  ;;  %v131_v46 = vld [vmem:[#allocation5 + $0x88] sm:$0xff]  ;;  %v130_v47 = vld [vmem:[#allocation5 + $0x58] sm:$0xff] }
  0xaa   :  { %264 = vmatpush.msrb.mxu1 %v131_v46 }
  0xab   :  { %181 = vmatmul.f32.vlgmr.msra.gmra.mxu1 %v422_v48 }
  0xac   :  { %265 = vmatpush.msrb.mxu1 %v130_v47 }
 0x128   :  { %v182_v1 = vpop.f32.mrf.mxu1 }
 0x129   :  { %v183_v2 = vadd.f32 %v182_v1, %v44_v0 }
 0x12b   :  { %v185_v3 = vmax.f32 %v183_v2, 0.0 }
 0x12d   :  { %202 = vmatmul.f32.vlgmr.msra.gmra.mxu2 %v185_v3 }
 0x1b0   :  { %v203_v22 = vpop.f32.mrf.mxu2 }
 0x1b1   :  { %v204_v23 = vadd.f32 %v203_v22, %v45_v21 }
 0x1b3   :  { %v206_v24 = vmax.f32 %v204_v23, 0.0 }
 0x1b5   :  { %v207_v25 = vadd.f32 %v206_v24, %v422_v48  ;;  %v129_v48 = vld [vmem:[#allocation5 + $0x28] sm:$0xff] }
 0x1b6   :  { %266 = vmatpush.msrb.mxu1 %v129_v48 }
 0x1b7   :  { %224 = vmatmul.f32.vlgmr.msra.gmra.mxu3 %v207_v25 }
 0x23a   :  { %v225_v42 = vpop.f32.mrf.mxu3 }
 0x23b   :  { %v226_v43 = vadd.f32 %v225_v42, %v46_v41 }
 0x23d   :  { %v228_v44 = vmax.f32 %v226_v43, 0.0 }
 0x23f   :  { %245 = vmatmul.f32.vlgmr.msrb.gmra.mxu0 %v228_v44 }
 0x2bc   :  { %v246_v50 = vpop.f32.mrf.mxu0 }
 0x2bd   :  { %v247_v51 = vadd.f32 %v246_v50, %v47_v49 }
 0x2bf   :  { %v249_v52 = vmax.f32 %v247_v51, 0.0 }
 0x2c1   :  { %v250_v53 = vadd.f32 %v249_v52, %v207_v25 }
 0x2c3   :  { %267 = vmatmul.f32.vlgmr.msrb.gmra.mxu1 %v250_v53 }
 0x340   :  { %v268_v57 = vpop.f32.mrf.mxu1 }
 0x341   :  { %v269_v58 = vadd.f32 %v268_v57, %v48_v56 }
 0x343   :  { %v274_v59 = vsel %vm273_vm0, %v269_v58, -inf }
 0x344   :  { %v276_v60 = vsel %vm275_vm1, %v274_v59, -inf }
 0x345   :  { %277 = vmax.xlane.f32.xlu0 %v276_v60 }
 0x3b8   :  { %v278_v61 = vpop.xlane.xlu0 %277 }
 0x3b9   :  { %v279_v62 = vsub.f32 %v274_v59, %v278_v61 }
 0x3bb   :  { %v280_v63 = vmul.f32 1.442695, %v279_v62 }
 0x3bd   :  { %314 = vpow2.f32 %v280_v63 }
 0x3c3   :  { %v315_v0 = vpop.eup %314 }
 0x3c4   :  { %v282_v1 = vsel %vm273_vm0, %v315_v0, 0.0 }
 0x3c5   :  { %v283_v2 = vsel %vm275_vm1, %v282_v1, 0.0 }
 0x3c6   :  { %284 = vadd.xlane.f32.xlu0 %v283_v2 }
 0x439   :  { %v285_v3 = vpop.xlane.xlu0 %284 }
 0x43a   :  { %316 = vlog2.f32 %v285_v3 }
 0x440   :  { %v317_v4 = vpop.eup %316 }
 0x441   :  { %v287_v5 = vmul.f32 0.6931472, %v317_v4 }
 0x443   :  { %v288_v6 = vsub.f32 %v279_v62, %v287_v5 }
 0x445   :  { %v289_v7 = vsel %vm273_vm0, %v288_v6, 0.0 }
 0x446   :  { %290 = vst [vmem:[#allocation7] sm:$0x1] %v289_v7 }
 0x447   :  { %301 = dma.vmem_to_hbm [thread:$0]  %s297_s1, 16, %s299_s23, [#allocation4]  }
 0x448   :  { %394 = dma.done.wait [#allocation4], 16  }
 0x449   :  { %395 = vsyncadd [#allocation4], 4294967280 }
 0x44a   :  { %306 = vsyncpa [#allocation3], 1 }
 0x44b   :  { %307 = vsyncpa [#allocation6], 1 }
 0x44c   :  { %308 = vsyncpa [#allocation4], 1 }

</bundles_post_ra>
